<compile_context>
chip_gen: v6e
topology: v6e:2x2x1
jax: 0.10.0
libtpu: 0.0.40
codegen_flags: <defaults>
</compile_context>

<pallas_src>
import functools

import jax
import jax.numpy as jnp
from jax.experimental import pallas as pl
from jax.experimental.pallas import tpu as pltpu


def _round_up(x, m):
    return ((x + m - 1) // m) * m


# ---------------------------------------------------------------------------
# Kernel: one batch tile of the fused actor+critic MLP
# ---------------------------------------------------------------------------
def mlp_base_fused_kernel(x_ref, w_ref, b_ref, out_ref, *, p_in, lane, n_action):
    """
    x_ref   : [Bt, p_in]             observation tile (zero-padded features)
    w_ref   : [p_in + 2*lane, lane]  packed weights
                rows [0, p_in)            layer-1: [aw1 | cw1] side by side
                rows [p_in, p_in+lane)    layer-2: blockdiag(aw2, cw2), zero padded
                rows [p_in+lane, +2*lane) layer-3: blockdiag(aw3, cw3), zero padded
    b_ref   : [8, lane]              rows 0/1/2 = fused biases of layers 1/2/3
    out_ref : [Bt, lane]             lanes 0..A-1 = action probs, lane A = critic
    """
    x = x_ref[...]

    # layer 1: actor hidden in lanes 0:H, critic hidden in lanes H:2H, zeros beyond.
    h = jnp.tanh(
        jnp.dot(x, w_ref[0:p_in, :], preferred_element_type=jnp.float32)
        + b_ref[0:1, :])
    # layer 2: block-diagonal; padded lanes of h are exactly 0 so they add nothing.
    h = jnp.tanh(
        jnp.dot(h, w_ref[p_in:p_in + lane, :], preferred_element_type=jnp.float32)
        + b_ref[1:2, :])
    # layer 3: actor logits in lanes 0:A, critic value in lane A.
    z = (jnp.dot(h, w_ref[p_in + lane:p_in + 2 * lane, :],
                 preferred_element_type=jnp.float32)
         + b_ref[2:3, :])

    lane_idx = jax.lax.broadcasted_iota(jnp.int32, z.shape, 1)
    is_action = lane_idx < n_action

    # F.softmax(exp(logits), dim=-1), restricted to the action lanes.
    e = jnp.where(is_action, jnp.exp(z), -jnp.inf)
    e_max = jnp.max(e, axis=-1, keepdims=True)
    p = jnp.where(is_action, jnp.exp(e - e_max), 0.0)
    denom = jnp.sum(p, axis=-1, keepdims=True)          # >= 1 for valid rows
    inv = pl.reciprocal(denom, approx=True)             # EUP slot (nearly free)
    inv = inv * (2.0 - denom * inv)                     # one Newton step -> ~f32-exact
    action = p * inv

    # Single lane-dense store: [action probs | critic | zeros].
    out_ref[...] = jnp.where(lane_idx == n_action, z, action)


# ---------------------------------------------------------------------------
# Batch-tile selection
# ---------------------------------------------------------------------------
def _choose_b_tile(B, b_tile, cap=2048):
    """Pick a multiple-of-8 batch tile.

    Auto mode: as big as possible (amortize ~0.35us/grid-step overhead), but
    keep >= 2 grid steps when B allows it so v7x's 2 TensorCores both get work
    via the "parallel" batch axis; capped at `cap` rows to keep the
    double-buffered x/out tiles a small fraction of scoped VMEM.
    """
    if b_tile is not None:
        return max(8, _round_up(b_tile, 8))
    if B <= 16:
        return _round_up(max(B, 1), 8)
    return min(cap, _round_up((B + 1) // 2, 8))


# ---------------------------------------------------------------------------
# Wrapper
# ---------------------------------------------------------------------------
def mlp_base_forward(x, packed, rnn_hxs, masks=None, *, n_action, b_tile=None):
    """Non-recurrent MLPBase.forward.

    x: [B, input_len] f32.  packed: {'w','b'} slabs from pack_params.
    masks is unused in the non-recurrent path (kept for signature parity).
    """
    del masks  # only used by the recurrent path (not implemented)
    B, input_len = x.shape
    w_slab = packed["w"]
    b_slab = packed["b"]
    lane = w_slab.shape[1]
    p_in = w_slab.shape[0] - 2 * lane

    # Feature pad only (batch stays ragged; the last partial block's rows are
    # garbage-in/garbage-out and never touch valid rows -- no cross-row
    # reduction exists in the kernel).  In most configs pad_f == 0.
    pad_f = p_in - input_len
    if pad_f:
        x = jnp.pad(x, ((0, 0), (0, pad_f)))

    bt = _choose_b_tile(B, b_tile)
    grid = (pl.cdiv(B, bt),)

    # Conditional scoped-VMEM bump: only needed for very large explicit tiles
    # (v5e's scoped default is 16 MiB; v6e/v7x default to 32 MiB).
    itemsize = 4
    x_tile_b = bt * p_in * itemsize
    out_tile_b = bt * lane * itemsize
    const_b = (w_slab.size + b_slab.size) * itemsize
    vmem_need = 2 * (x_tile_b + out_tile_b) + 2 * const_b + 6 * out_tile_b
    cp_kwargs = dict(dimension_semantics=("parallel",))
    if vmem_need > 12 * 1024 * 1024:
        cp_kwargs["vmem_limit_bytes"] = min(int(vmem_need * 3 // 2),
                                            60 * 1024 * 1024)

    kernel = functools.partial(mlp_base_fused_kernel,
                               p_in=p_in, lane=lane, n_action=n_action)

    out = pl.pallas_call(
        kernel,
        out_shape=jax.ShapeDtypeStruct((B, lane), jnp.float32),
        grid_spec=pltpu.PrefetchScalarGridSpec(
            num_scalar_prefetch=0,
            grid=grid,
            in_specs=[
                pl.BlockSpec((bt, p_in), lambda i: (i, 0)),     # x tile per step
                pl.BlockSpec(w_slab.shape, lambda i: (0, 0)),   # weights: resident
                pl.BlockSpec(b_slab.shape, lambda i: (0, 0)),   # biases:  resident
            ],
            out_specs=pl.BlockSpec((bt, lane), lambda i: (i, 0)),
        ),
        compiler_params=pltpu.CompilerParams(**cp_kwargs),
    )(x, w_slab, b_slab)

    # Single slab slice; split action/critic from that one slice.
    head = out[:, :n_action + 1]
    action = head[:, :n_action]
    critic = head[:, n_action:n_action + 1]
    # non-recurrent: rnn_hxs is passed through unchanged
    return action, critic, rnn_hxs


# ---------------------------------------------------------------------------
# Parameter construction / packing
# ---------------------------------------------------------------------------
def init_params(key, input_len, hidden_dim, n_action):
    """Deterministic synthetic init (weights stored pre-transposed as [in, out])."""
    def lin(k, fan_in, fan_out):
        kw, kb = jax.random.split(k)
        bound = 1.0 / jnp.sqrt(fan_in)
        w = jax.random.uniform(kw, (fan_in, fan_out), jnp.float32, -bound, bound)
        b = jax.random.uniform(kb, (1, fan_out), jnp.float32, -bound, bound)
        return w, b

    keys = jax.random.split(key, 6)
    aw1, ab1 = lin(keys[0], input_len, hidden_dim)
    aw2, ab2 = lin(keys[1], hidden_dim, hidden_dim)
    aw3, ab3 = lin(keys[2], hidden_dim, n_action)
    cw1, cb1 = lin(keys[3], input_len, hidden_dim)
    cw2, cb2 = lin(keys[4], hidden_dim, hidden_dim)
    cw3, cb3 = lin(keys[5], hidden_dim, 1)
    return dict(aw1=aw1, ab1=ab1, aw2=aw2, ab2=ab2, aw3=aw3, ab3=ab3,
                cw1=cw1, cb1=cb1, cw2=cw2, cb2=cb2, cw3=cw3, cb3=cb3)


def pack_params(params, input_len, hidden_dim, n_action):
    """Pack the 12 Linear tensors into one weight slab + one bias slab."""
    H = hidden_dim
    H2 = 2 * H
    A = n_action
    lane = _round_up(max(H2, A + 1), 128)   # common lane width for hidden + output
    p_in = _round_up(input_len, 8)          # keep slab row slices 8-sublane aligned

    w = jnp.zeros((p_in + 2 * lane, lane), jnp.float32)
    # layer 1: [aw1 | cw1]
    w = w.at[0:input_len, 0:H].set(params["aw1"])
    w = w.at[0:input_len, H:H2].set(params["cw1"])
    # layer 2: blockdiag(aw2, cw2)
    r = p_in
    w = w.at[r:r + H, 0:H].set(params["aw2"])
    w = w.at[r + H:r + H2, H:H2].set(params["cw2"])
    # layer 3: actor logits -> lanes 0:A, critic -> lane A
    r = p_in + lane
    w = w.at[r:r + H, 0:A].set(params["aw3"])
    w = w.at[r + H:r + H2, A:A + 1].set(params["cw3"])

    b = jnp.zeros((8, lane), jnp.float32)
    b = b.at[0, 0:H].set(params["ab1"][0])
    b = b.at[0, H:H2].set(params["cb1"][0])
    b = b.at[1, 0:H].set(params["ab2"][0])
    b = b.at[1, H:H2].set(params["cb2"][0])
    b = b.at[2, 0:A].set(params["ab3"][0])
    b = b.at[2, A:A + 1].set(params["cb3"][0])
    return {"w": w, "b": b}


# ---------------------------------------------------------------------------
# Pure-JAX reference (mirrors the PyTorch forward on the UNPACKED params)
# ---------------------------------------------------------------------------
def reference_forward(x, params, rnn_hxs):
    a = jnp.tanh(x @ params["aw1"] + params["ab1"])
    a = jnp.tanh(a @ params["aw2"] + params["ab2"])
    action = jax.nn.softmax(jnp.exp(a @ params["aw3"] + params["ab3"]), axis=-1)
    c = jnp.tanh(x @ params["cw1"] + params["cb1"])
    c = jnp.tanh(c @ params["cw2"] + params["cb2"])
    critic = c @ params["cw3"] + params["cb3"]
    return action, critic, rnn_hxs


if __name__ == "__main__":
    # Small, module-consistent config.  B is deliberately NOT a multiple of the
    # auto batch tile (and not of 8) to exercise the ragged last block that
    # replaced the old batch-dim jnp.pad.  Auto tiling gives bt=32 -> 2 grid
    # steps (both v7x TensorCores get work; 1 extra 0.35us step on v5e/v6e).
    B, input_len, hidden_dim, n_action = 50, 16, 32, 6

    key = jax.random.PRNGKey(0)
    k_x, k_p = jax.random.split(key)
    x = jax.random.normal(k_x, (B, input_len), jnp.float32)
    rnn_hxs = jnp.zeros((B, 1), jnp.float32)   # recurrent_hidden_state_size == 1 when rnn=False
    masks = jnp.ones((B, 1), jnp.float32)      # unused in non-recurrent path

    params = init_params(k_p, input_len, hidden_dim, n_action)
    packed = pack_params(params, input_len, hidden_dim, n_action)

    fwd = jax.jit(functools.partial(mlp_base_forward, n_action=n_action))
    action, critic, hxs_out = fwd(x, packed, rnn_hxs, masks)
    jax.block_until_ready((action, critic, hxs_out))

    # correctness check vs pure-JAX reference on the original (unpacked) params
    action_ref, critic_ref, _ = reference_forward(x, params, rnn_hxs)
    assert action.shape == (B, n_action) and critic.shape == (B, 1)
    assert jnp.allclose(action, action_ref, atol=1e-5, rtol=1e-5)
    assert jnp.allclose(critic, critic_ref, atol=1e-5, rtol=1e-5)
    assert jnp.allclose(jnp.sum(action, axis=-1), 1.0, atol=1e-5)

    print("KERNEL_OK")
</pallas_src>

<mosaic_0001>
module attributes {stable_mosaic.version = 11 : i64} {
  func.func @mlp_base_fused_kernel(%arg0: i32, %arg1: memref<32x16xf32, #tpu.memory_space<vmem>>, %arg2: memref<272x128xf32, #tpu.memory_space<vmem>>, %arg3: memref<8x128xf32, #tpu.memory_space<vmem>>, %arg4: memref<32x128xf32, #tpu.memory_space<vmem>>) attributes {dimension_semantics = [#tpu.dimension_semantics<parallel>], iteration_bounds = array<i64: 2>, scalar_prefetch = 0 : i64, scratch_operands = 0 : i64, tpu.core_type = #tpu.core_type<tc>, window_params = [{transform_indices = @transform_0, window_bounds = array<i64: 32, 16>}, {pipeline_mode = #tpu.pipeline_mode<synchronous>, transform_indices = @transform_1, window_bounds = array<i64: 272, 128>}, {pipeline_mode = #tpu.pipeline_mode<synchronous>, transform_indices = @transform_2, window_bounds = array<i64: 8, 128>}, {transform_indices = @transform_3, window_bounds = array<i64: 32, 128>}]} {
    %c0 = arith.constant 0 : index
    %c0_0 = arith.constant 0 : index
    %0 = vector.load %arg1[%c0, %c0_0] : memref<32x16xf32, #tpu.memory_space<vmem>>, vector<32x16xf32>
    %c0_1 = arith.constant 0 : index
    %c0_2 = arith.constant 0 : index
    %1 = vector.load %arg2[%c0_1, %c0_2] : memref<272x128xf32, #tpu.memory_space<vmem>>, vector<16x128xf32>
    %cst = arith.constant dense<0.000000e+00> : vector<32x128xf32>
    %2 = tpu.matmul %0, %1, %cst {dimension_numbers = #tpu.dot_dimension_numbers<[1], [0], [0], [1], [0, 0, 1, 1], [], []>} : vector<32x16xf32>, vector<16x128xf32>, vector<32x128xf32> -> vector<32x128xf32>
    %c0_3 = arith.constant 0 : index
    %c0_4 = arith.constant 0 : index
    %3 = vector.load %arg3[%c0_3, %c0_4] : memref<8x128xf32, #tpu.memory_space<vmem>>, vector<1x128xf32>
    %4 = vector.broadcast %3 : vector<1x128xf32> to vector<32x128xf32>
    %5 = arith.addf %2, %4 : vector<32x128xf32>
    %6 = math.tanh %5 : vector<32x128xf32>
    %c16 = arith.constant 16 : index
    %c0_5 = arith.constant 0 : index
    %7 = vector.load %arg2[%c16, %c0_5] : memref<272x128xf32, #tpu.memory_space<vmem>>, vector<128x128xf32>
    %cst_6 = arith.constant dense<0.000000e+00> : vector<32x128xf32>
    %8 = tpu.matmul %6, %7, %cst_6 {dimension_numbers = #tpu.dot_dimension_numbers<[1], [0], [0], [1], [0, 0, 1, 1], [], []>} : vector<32x128xf32>, vector<128x128xf32>, vector<32x128xf32> -> vector<32x128xf32>
    %c1 = arith.constant 1 : index
    %c0_7 = arith.constant 0 : index
    %9 = vector.load %arg3[%c1, %c0_7] : memref<8x128xf32, #tpu.memory_space<vmem>>, vector<1x128xf32>
    %10 = vector.broadcast %9 : vector<1x128xf32> to vector<32x128xf32>
    %11 = arith.addf %8, %10 : vector<32x128xf32>
    %12 = math.tanh %11 : vector<32x128xf32>
    %c144 = arith.constant 144 : index
    %c0_8 = arith.constant 0 : index
    %13 = vector.load %arg2[%c144, %c0_8] : memref<272x128xf32, #tpu.memory_space<vmem>>, vector<128x128xf32>
    %cst_9 = arith.constant dense<0.000000e+00> : vector<32x128xf32>
    %14 = tpu.matmul %12, %13, %cst_9 {dimension_numbers = #tpu.dot_dimension_numbers<[1], [0], [0], [1], [0, 0, 1, 1], [], []>} : vector<32x128xf32>, vector<128x128xf32>, vector<32x128xf32> -> vector<32x128xf32>
    %c2 = arith.constant 2 : index
    %c0_10 = arith.constant 0 : index
    %15 = vector.load %arg3[%c2, %c0_10] : memref<8x128xf32, #tpu.memory_space<vmem>>, vector<1x128xf32>
    %16 = vector.broadcast %15 : vector<1x128xf32> to vector<32x128xf32>
    %17 = arith.addf %14, %16 : vector<32x128xf32>
    %18 = tpu.iota {dimensions = array<i32: 1>} : vector<32x128xi32>
    %c6_i32 = arith.constant 6 : i32
    %19 = vector.broadcast %c6_i32 : i32 to vector<32x128xi32>
    %20 = arith.cmpi slt, %18, %19 : vector<32x128xi32>
    %21 = math.exp %17 : vector<32x128xf32>
    %cst_11 = arith.constant 0xFF800000 : f32
    %22 = vector.broadcast %cst_11 : f32 to vector<32x128xf32>
    %23 = arith.select %20, %21, %22 : vector<32x128xi1>, vector<32x128xf32>
    %cst_12 = arith.constant dense<0xFF800000> : vector<32xf32>
    %24 = vector.multi_reduction <maximumf>, %23, %cst_12 [1] : vector<32x128xf32> to vector<32xf32>
    %25 = vector.shape_cast %24 : vector<32xf32> to vector<32x1xf32>
    %26 = vector.broadcast %25 : vector<32x1xf32> to vector<32x128xf32>
    %27 = arith.subf %23, %26 : vector<32x128xf32>
    %28 = math.exp %27 : vector<32x128xf32>
    %cst_13 = arith.constant 0.000000e+00 : f32
    %29 = vector.broadcast %cst_13 : f32 to vector<32x128xf32>
    %30 = arith.select %20, %28, %29 : vector<32x128xi1>, vector<32x128xf32>
    %cst_14 = arith.constant dense<0.000000e+00> : vector<32xf32>
    %31 = vector.multi_reduction <add>, %30, %cst_14 [1] : vector<32x128xf32> to vector<32xf32>
    %32 = vector.shape_cast %31 : vector<32xf32> to vector<32x1xf32>
    %33 = tpu.reciprocal %32 {approx = true} : vector<32x1xf32> -> vector<32x1xf32>
    %34 = arith.mulf %32, %33 : vector<32x1xf32>
    %cst_15 = arith.constant 2.000000e+00 : f32
    %35 = vector.broadcast %cst_15 : f32 to vector<32x1xf32>
    %36 = arith.subf %35, %34 : vector<32x1xf32>
    %37 = arith.mulf %33, %36 : vector<32x1xf32>
    %38 = vector.broadcast %37 : vector<32x1xf32> to vector<32x128xf32>
    %39 = arith.mulf %30, %38 : vector<32x128xf32>
    %c6_i32_16 = arith.constant 6 : i32
    %40 = vector.broadcast %c6_i32_16 : i32 to vector<32x128xi32>
    %41 = arith.cmpi eq, %18, %40 : vector<32x128xi32>
    %42 = arith.select %41, %17, %39 : vector<32x128xi1>, vector<32x128xf32>
    %c0_17 = arith.constant 0 : index
    %c0_18 = arith.constant 0 : index
    %43 = vector.load %arg4[%c0_17, %c0_18] : memref<32x128xf32, #tpu.memory_space<vmem>>, vector<32x128xf32>
    tpu.vector_store %arg4[%c0_17, %c0_18], %42 {strides = array<i32>} : memref<32x128xf32, #tpu.memory_space<vmem>>, vector<32x128xf32>,
    return
  }
  func.func @transform_0(%arg0: i32) -> (i32, i32) {
    %c0_i32 = arith.constant 0 : i32
    %c0_i32_0 = arith.constant 0 : i32
    return %arg0, %c0_i32 : i32, i32
  }
  func.func @transform_1(%arg0: i32) -> (i32, i32) {
    %c0_i32 = arith.constant 0 : i32
    %c0_i32_0 = arith.constant 0 : i32
    %c0_i32_1 = arith.constant 0 : i32
    return %c0_i32, %c0_i32_0 : i32, i32
  }
  func.func @transform_2(%arg0: i32) -> (i32, i32) {
    %c0_i32 = arith.constant 0 : i32
    %c0_i32_0 = arith.constant 0 : i32
    %c0_i32_1 = arith.constant 0 : i32
    return %c0_i32, %c0_i32_0 : i32, i32
  }
  func.func @transform_3(%arg0: i32) -> (i32, i32) {
    %c0_i32 = arith.constant 0 : i32
    %c0_i32_0 = arith.constant 0 : i32
    return %arg0, %c0_i32 : i32, i32
  }
}

</mosaic_0001>

<bundles_post_ra>
// kernel: mlp_base_forward.1
= control target key start
LH: loop header
LB: loop body
LE: loop exit
PB: predicated region body
PF: predicated region fallthrough
CT: control target
= control target key end

     0   :  { %8 = vsyncpa [#allocation3], 0  ;;  %s1302_s12 = smov 0   ;;  %s1304_s13 = smov 0   ;;  %s1477_s0 = inlined_call_operand.vmem [shape: f32[50,16], index: 0, kind: input, shape index: {}]   ;;  %s1478_s1 = inlined_call_operand.hbm [shape: f32[272,128], index: 1, kind: input, shape index: {}]   ;;  %s1479_s2 = inlined_call_operand.vmem [shape: f32[8,128], index: 2, kind: input, shape index: {}]   ;;  %s1480_s3 = inlined_call_operand.vmem [shape: f32[50,128], index: 3, kind: output, shape index: {}]  }
   0x1   :  { %s1306_s14 = smov 0  }
   0x2 LB: > { %s1315_s15 = sadd.s32 4294967295, %s1245_s14   ;;  %s1317_s16 = sadd.s32 1, %s1245_s14   ;;  %s1245_s14 = sphi %s1306_s14, %s1488_s14   ;;  %s1241_s13 = sphi %s1304_s13, %s1487_s13   ;;  %s1237_s12 = sphi %s1302_s12, %s1486_s12  }
   0x3   : > { %s86_s17 = ssub.s32 %s1245_s14, %s1317_s16  ;;  %s89_s18 = sadd.s32 1, %s1241_s13 }
   0x4   : > { %p87_p0 = scmp.eq.s32.totalorder %s86_s17, 0  ;;  %p99_p1 = scmp.ne.s32.totalorder %s1241_s13, %s1237_s12 }
   0x5   : > { %p100_p2 = scmp.eq.s32.totalorder %s1315_s15, 1  ;;  %p853_p3 = scmp.ge.s32.totalorder %s1245_s14, 1 }
   0x6   : > { %s1325_s19 = scalar_select %p87_p0, %s1241_s13, %s89_s18  }
   0x7   : > { %p1327_p4 = por %p100_p2, %p99_p1  ;;  %p113_p5 = scmp.lt.s32.totalorder %s1245_s14, 3 }
   0x8   : > { %p1028_p6 = scmp.eq.s32.totalorder %s1315_s15, 0  ;;  %s1279_s22 = smov [#allocation2]  }
   0x9   : > { %p1332_p7 = pnand %p853_p3, %p113_p5  ;;  %s125_s23 = sshll.u32 %s1279_s22, 4  ;;  %s126_s23 = int_to_ptr.vmem [resolvable:$true] %s125_s23 }
   0xa   : > { %s1172_s24 = scalar_lea.vmem %s126_s23, 4352  ;;  %p1180_p0 = scmp.lt.s32.totalorder %s126_s23, %s126_s23 }
   0xb   : > { %p1024_p8 = pneg %p1332_p7  ;;  %p1173_p11 = scmp.ne.s32.totalorder %s126_s23, %s1172_s24 }
   0xc   : > { %p1181_p1 = scmp.lt.s32.totalorder %s1172_s24, %s1172_s24 }
   0xd   : > { %p1025_p9 = pnand %p1028_p6, %p1024_p8 }
   0xe   : > { %p1182_p2 = por %p1181_p1, %p1180_p0 }
   0xf   : > { %p1163_p10 = pneg %p1025_p9 }
  0x11   : > { %p1175_p12 = pnand %p1173_p11, %p1163_p10 }
  0x13   : > { %p1176_p13 = pneg %p1175_p12 }
  0x15   : > { %p1183_p3 = pnand %p1182_p2, %p1176_p13 }
  0x17   : > { %1186 = shalt.err (!%p1183_p3)
}
  0x18   : > { %s1280_s25 = smov 128   ;;  %s1281_s26 = smov 8  }
  0x19   : > { %1027 = dma.hbm_to_vmem [thread:$0]  (!%p1025_p9), %s1478_s1, 4352, %s126_s23, [#allocation3], %s1280_s25, %s1280_s25, %s1281_s26  }
  0x1a   : > { %161 = sbr.rel (%p1332_p7) target bundleno = 1046 (0x416), region = 32 }
  0x1f   : > { %1232 = dma.done.wait (%p1028_p6), [#allocation3], 4352  }
  0x20   : > { %1234 = vsyncadd (%p1028_p6), [#allocation3], 4294962944  ;;  %s1350_s29 = sshll.u32 %s1315_s15, 2  ;;  %vm218_vm0 = vcmask 130048   ;;  %v212_v0 = vld [vmem:[#allocation2 + $0x8] sm:$0xff]  ;;  %v211_v1 = vld [vmem:[#allocation2] sm:$0xff] }
  0x21   : > { %p193_p5 = scmp.lt.s32.totalorder %s1350_s29, 6  ;;  %934 = vmatprep.subr.mxu0 %v212_v0  ;;  %v335_v4 = vld [vmem:[#allocation2 + $0x88] sm:$0xff]  ;;  %v334_v5 = vld [vmem:[#allocation2 + $0x80] sm:$0xff]  ;;  %v333_v7 = vld [vmem:[#allocation2 + $0x78] sm:$0xff]  ;;  %s185_s18 = sand.u32 1, %s1237_s12  }
  0x22   : > { %935 = vmatpush3.msra.mxu0 %v212_v0  ;;  %944 = vmatprep.subr.mxu1 %v335_v4  ;;  %v332_v9 = vld [vmem:[#allocation2 + $0x70] sm:$0xff]  ;;  %v331_v10 = vld [vmem:[#allocation2 + $0x68] sm:$0xff]  ;;  %v330_v11 = vld [vmem:[#allocation2 + $0x60] sm:$0xff]  ;;  %s858_s21 = sshll.u32 %s185_s18, 5  ;;  %s620_s22 = ssub.s32 (%p1327_p4), 7, %s1350_s29 }
  0x23   : > { %s194_s30 = scalar_select %p193_p5, %s1350_s29, 6  ;;  %936 = vmatprep.subr.mxu0 %v211_v1  ;;  %945 = vmatpush3.msra.mxu1 %v335_v4  ;;  %v329_v12 = vld [vmem:[#allocation2 + $0x58] sm:$0xff]  ;;  %v328_v13 = vld [vmem:[#allocation2 + $0x50] sm:$0xff]  ;;  %v327_v14 = vld [vmem:[#allocation2 + $0x48] sm:$0xff] }
  0x24   : > { %937 = vmatpush3.msra.mxu0 %v211_v1  ;;  %946 = vmatprep.subr.mxu1 %v334_v5  ;;  %v326_v15 = vld [vmem:[#allocation2 + $0x40] sm:$0xff]  ;;  %v325_v16 = vld [vmem:[#allocation2 + $0x38] sm:$0xff]  ;;  %v324_v17 = vld [vmem:[#allocation2 + $0x30] sm:$0xff]  ;;  %s1406_s12 = scalar_lea.vmem [#allocation4], %s858_s21   ;;  %s885_s23 = sshll.u32 (%p1327_p4), %s1315_s15, 5 }
  0x25   : > { %s860_s4 = sshll.u32 %s194_s30, 3  ;;  %947 = vmatpush3.msra.mxu1 %v334_v5  ;;  %v323_v18 = vld [vmem:[#allocation2 + $0x28] sm:$0xff]  ;;  %v322_v19 = vld [vmem:[#allocation2 + $0x20] sm:$0xff]  ;;  %v321_v20 = vld [vmem:[#allocation2 + $0x18] sm:$0xff]  ;;  %p621_p6 = scmp.lt.s32.totalorder (%p1327_p4), %s620_s22, 4 }
  0x26   : > { %s196_s7 = scalar_lea.vmem %s1477_s0, %s860_s4  ;;  %948 = vmatprep.subr.mxu1 %v333_v7  ;;  %v320_v21 = vld [vmem:[#allocation2 + $0x10] sm:$0xff]  ;;  %v445_v22 = vld [vmem:[#allocation2 + $0x108] sm:$0xff]  ;;  %v444_v23 = vld [vmem:[#allocation2 + $0x100] sm:$0xff]  ;;  %s1428_s26 = scalar_lea.vmem (%p1327_p4), %s1480_s3, %s885_s23  }
  0x27   : > { %v207_v2 = vld [vmem:[%s196_s7] sm:$0xff]  ;;  %v208_v3 = vld [vmem:[%s196_s7 + $0x8] sm:$0xff]  ;;  %v209_v6 = vld [vmem:[%s196_s7 + $0x10] sm:$0xff]  ;;  %949 = vmatpush3.msra.mxu1 %v333_v7  ;;  %982 = vmatprep.subr.mxu0 %v445_v22 }
  0x28   : > { %938 = vmatprep.mubr.msk.f32.mxu0 %vm218_vm0, %v207_v2  ;;  %v210_v8 = vld [vmem:[%s196_s7 + $0x18] sm:$0xff]  ;;  %950 = vmatprep.subr.mxu1 %v332_v9  ;;  %v442_v25 = vld [vmem:[#allocation2 + $0xf0] sm:$0xff]  ;;  %v441_v26 = vld [vmem:[#allocation2 + $0xe8] sm:$0xff] }
  0x29   : > { %939 = vmatmul.mubr.msk.f32.vlgmr.msra.gmra.mxu0 %vm218_vm0, %v208_v3  ;;  %951 = vmatpush3.msra.mxu1 %v332_v9  ;;  %v443_v24 = vld [vmem:[#allocation2 + $0xf8] sm:$0xff]  ;;  %v440_v27 = vld [vmem:[#allocation2 + $0xe0] sm:$0xff]  ;;  %v438_v42 = vld [vmem:[#allocation2 + $0xd0] sm:$0xff] }
  0x2a   : > { %941 = vmatprep.mubr.msk.f32.mxu0 %vm218_vm0, %v209_v6  ;;  %952 = vmatprep.subr.mxu1 %v331_v10  ;;  %v861_v28 = vld [vmem:[%s1479_s2] ss:$0 sm:$0xff]  ;;  %v439_v41 = vld [vmem:[#allocation2 + $0xd8] sm:$0xff]  ;;  %v437_v43 = vld [vmem:[#allocation2 + $0xc8] sm:$0xff] }
  0x2b   : > { %953 = vmatpush3.msra.mxu1 %v331_v10  ;;  %983 = vmatpush3.msra.mxu0 %v445_v22  ;;  %v436_v44 = vld [vmem:[#allocation2 + $0xc0] sm:$0xff]  ;;  %v435_v45 = vld [vmem:[#allocation2 + $0xb8] sm:$0xff]  ;;  %v434_v46 = vld [vmem:[#allocation2 + $0xb0] sm:$0xff] }
  0x2c   : > { %954 = vmatprep.subr.mxu1 %v330_v11  ;;  %984 = vmatprep.subr.mxu0 %v444_v23  ;;  %v433_v47 = vld [vmem:[#allocation2 + $0xa8] sm:$0xff]  ;;  %v432_v48 = vld [vmem:[#allocation2 + $0xa0] sm:$0xff]  ;;  %v431_v49 = vld [vmem:[#allocation2 + $0x98] sm:$0xff] }
  0x2d   : > { %942 = vmatmul.mubr.msk.f32.gmra.mxu0 %vm218_vm0, %v210_v8  ;;  %955 = vmatpush3.msra.mxu1 %v330_v11  ;;  %v430_v50 = vld [vmem:[#allocation2 + $0x90] sm:$0xff]  ;;  %v866_v51 = vld [vmem:[%s1479_s2 + $0x1] ss:$0 sm:$0xff]  ;;  %v867_v0 = vld [vmem:[%s1479_s2 + $0x2] ss:$0 sm:$0xff] }
  0x2e   : > { %956 = vmatprep.subr.mxu1 %v329_v12  ;;  %985 = vmatpush3.msra.mxu0 %v444_v23 }
  0x2f   : > { %957 = vmatpush3.msra.mxu1 %v329_v12  ;;  %986 = vmatprep.subr.mxu0 %v443_v24 }
  0x30   : > { %958 = vmatprep.subr.mxu1 %v328_v13  ;;  %987 = vmatpush3.msra.mxu0 %v443_v24 }
  0x31   : > { %959 = vmatpush3.msra.mxu1 %v328_v13  ;;  %988 = vmatprep.subr.mxu0 %v442_v25  ;;  %v536_v13 = vlaneseq }
  0x32   : > { %960 = vmatprep.subr.mxu1 %v327_v14  ;;  %989 = vmatpush3.msra.mxu0 %v442_v25 }
  0x33   : > { %961 = vmatpush3.msra.mxu1 %v327_v14  ;;  %990 = vmatprep.subr.mxu0 %v441_v26  ;;  %v1382_v14 = vand.u32 127, %v536_v13 }
  0x34   : > { %962 = vmatprep.subr.mxu1 %v326_v15  ;;  %991 = vmatpush3.msra.mxu0 %v441_v26 }
  0x35   : > { %963 = vmatpush3.msra.mxu1 %v326_v15  ;;  %992 = vmatprep.subr.mxu0 %v440_v27  ;;  %vm538_vm1 = vcmp.lt.s32.totalorder %v1382_v14, 6  ;;  %vm603_vm2 = vcmp.eq.s32.totalorder %v1382_v14, 6 }
  0x36   : > { %964 = vmatprep.subr.mxu1 %v325_v16  ;;  %993 = vmatpush3.msra.mxu0 %v440_v27 }
  0x37   : > { %965 = vmatpush3.msra.mxu1 %v325_v16  ;;  %994 = vmatprep.subr.mxu0 %v439_v41 }
  0x38   : > { %966 = vmatprep.subr.mxu1 %v324_v17  ;;  %995 = vmatpush3.msra.mxu0 %v439_v41 }
  0x39   : > { %967 = vmatpush3.msra.mxu1 %v324_v17  ;;  %996 = vmatprep.subr.mxu0 %v438_v42 }
  0x3a   : > { %968 = vmatprep.subr.mxu1 %v323_v18  ;;  %997 = vmatpush3.msra.mxu0 %v438_v42 }
  0x3b   : > { %969 = vmatpush3.msra.mxu1 %v323_v18  ;;  %998 = vmatprep.subr.mxu0 %v437_v43 }
  0x3c   : > { %970 = vmatprep.subr.mxu1 %v322_v19  ;;  %999 = vmatpush3.msra.mxu0 %v437_v43 }
  0x3d   : > { %971 = vmatpush3.msra.mxu1 %v322_v19  ;;  %1000 = vmatprep.subr.mxu0 %v436_v44 }
  0x3e   : > { %972 = vmatprep.subr.mxu1 %v321_v20  ;;  %1001 = vmatpush3.msra.mxu0 %v436_v44 }
  0x3f   : > { %973 = vmatpush3.msra.mxu1 %v321_v20  ;;  %1002 = vmatprep.subr.mxu0 %v435_v45 }
  0x40   : > { %974 = vmatprep.subr.mxu1 %v320_v21  ;;  %1003 = vmatpush3.msra.mxu0 %v435_v45 }
  0x41   : > { %975 = vmatpush3.msra.mxu1 %v320_v21  ;;  %1004 = vmatprep.subr.mxu0 %v434_v46 }
  0x42   : > { %1005 = vmatpush3.msra.mxu0 %v434_v46 }
  0x43   : > { %1006 = vmatprep.subr.mxu0 %v433_v47 }
  0x44   : > { %1007 = vmatpush3.msra.mxu0 %v433_v47 }
  0x45   : > { %1008 = vmatprep.subr.mxu0 %v432_v48 }
  0x46   : > { %1009 = vmatpush3.msra.mxu0 %v432_v48 }
  0x47   : > { %1010 = vmatprep.subr.mxu0 %v431_v49 }
  0x48   : > { %1011 = vmatpush3.msra.mxu0 %v431_v49 }
  0x49   : > { %1012 = vmatprep.subr.mxu0 %v430_v50 }
  0x4a   : > { %1013 = vmatpush3.msra.mxu0 %v430_v50 }
  0xe9   : > { %v940_v29 = vpop.f32.mrf.mxu0 }
  0xea   : > { %v303_v30 = vadd.f32 %v940_v29, %v861_v28 }
  0xeb   : > { %v297_v31 = vpop.f32.mrf.mxu0 }
  0xec   : > { %v298_v32 = vadd.f32 %v861_v28, %v297_v31 }
  0xed   : > { %v943_v33 = vpop.f32.mrf.mxu0 }
  0xee   : > { %1121 = vtanh.f32 %v298_v32  ;;  %v313_v34 = vadd.f32 %v943_v33, %v861_v28 }
  0xef   : > { %1123 = vtanh.f32 %v303_v30  ;;  %v307_v35 = vpop.f32.mrf.mxu0 }
  0xf0   : > { %v308_v36 = vadd.f32 %v861_v28, %v307_v35 }
  0xf2   : > { %1125 = vtanh.f32 %v308_v36 }
  0xf3   : > { %1127 = vtanh.f32 %v313_v34 }
  0xfb   : > { %v1122_v37 = vpop.eup %1121 }
  0xfc   : > { %v1124_v38 = vpop.eup %1123  ;;  %976 = vmatprep.mubr.f32.mxu1 %v1122_v37 }
  0xfd   : > { %977 = vmatmul.mubr.f32.vlgmr.msra.gmra.mxu1 %v1124_v38 }
  0xff   : > { %v1126_v39 = vpop.eup %1125 }
 0x100   : > { %v1128_v40 = vpop.eup %1127  ;;  %979 = vmatprep.mubr.f32.mxu1 %v1126_v39 }
 0x101   : > { %980 = vmatmul.mubr.f32.gmra.mxu1 %v1128_v40 }
 0x1bd   : > { %v978_v52 = vpop.f32.mrf.mxu1 }
 0x1be   : > { %v413_v53 = vadd.f32 %v978_v52, %v866_v51 }
 0x1bf   : > { %v407_v54 = vpop.f32.mrf.mxu1 }
 0x1c0   : > { %v408_v55 = vadd.f32 %v866_v51, %v407_v54 }
 0x1c1   : > { %v981_v56 = vpop.f32.mrf.mxu1 }
 0x1c2   : > { %1129 = vtanh.f32 %v408_v55  ;;  %v423_v57 = vadd.f32 %v981_v56, %v866_v51 }
 0x1c3   : > { %1131 = vtanh.f32 %v413_v53  ;;  %v417_v58 = vpop.f32.mrf.mxu1 }
 0x1c4   : > { %v418_v59 = vadd.f32 %v866_v51, %v417_v58 }
 0x1c6   : > { %1133 = vtanh.f32 %v418_v59 }
 0x1c7   : > { %1135 = vtanh.f32 %v423_v57 }
 0x1cf   : > { %v1130_v60 = vpop.eup %1129 }
 0x1d0   : > { %v1132_v61 = vpop.eup %1131  ;;  %1014 = vmatprep.mubr.f32.mxu0 %v1130_v60 }
 0x1d1   : > { %1015 = vmatmul.mubr.f32.vlgmr.msra.gmra.mxu0 %v1132_v61 }
 0x1d3   : > { %v1134_v62 = vpop.eup %1133 }
 0x1d4   : > { %v1136_v63 = vpop.eup %1135  ;;  %1017 = vmatprep.mubr.f32.mxu0 %v1134_v62 }
 0x1d5   : > { %1018 = vmatmul.mubr.f32.gmra.mxu0 %v1136_v63 }
 0x291   : > { %v1016_v1 = vpop.f32.mrf.mxu0 }
 0x292   : > { %v1370_v2 = vadd.f32 %v1016_v1, %v867_v0 }
 0x293   : > { %v517_v3 = vpop.f32.mrf.mxu0 }
 0x294   : > { %v1372_v4 = vadd.f32 %v867_v0, %v517_v3  ;;  %v541_v6 = vmul.f32 1.442695, %v1370_v2 }
 0x295   : > { %v1019_v5 = vpop.f32.mrf.mxu0 }
 0x296   : > { %v539_v7 = vmul.f32 1.442695, %v1372_v4  ;;  %v1376_v8 = vadd.f32 %v1019_v5, %v867_v0 }
 0x297   : > { %v527_v9 = vpop.f32.mrf.mxu0 }
 0x298   : > { %1137 = vpow2.f32 %v539_v7  ;;  %v1378_v10 = vadd.f32 %v867_v0, %v527_v9  ;;  %v545_v11 = vmul.f32 1.442695, %v1376_v8 }
 0x299   : > { %1139 = vpow2.f32 %v541_v6 }
 0x29a   : > { %v543_v12 = vmul.f32 1.442695, %v1378_v10 }
 0x29c   : > { %1141 = vpow2.f32 %v543_v12 }
 0x29d   : > { %1143 = vpow2.f32 %v545_v11 }
 0x2a5   : > { %v1138_v15 = vpop.eup %1137 }
 0x2a6   : > { %v547_v16 = vsel %vm538_vm1, %v1138_v15, -inf  ;;  %v1140_v17 = vpop.eup %1139 }
 0x2a7   : > { %551 = vmax.xlane.f32.xlu0 %v547_v16  ;;  %v548_v20 = vsel %vm538_vm1, %v1140_v17, -inf }
 0x2a9   : > { %v1142_v18 = vpop.eup %1141 }
 0x2aa   : > { %v549_v19 = vsel %vm538_vm1, %v1142_v18, -inf  ;;  %v1144_v21 = vpop.eup %1143 }
 0x2ab   : > { %555 = vmax.xlane.f32.xlu1 %v549_v19  ;;  %553 = vmax.xlane.f32.xlu0 %v548_v20  ;;  %v550_v22 = vsel %vm538_vm1, %v1144_v21, -inf }
 0x2af   : > { %557 = vmax.xlane.f32.xlu1 %v550_v22 }
 0x330   : > { %v552_v23 = vpop.xlane.xlu0 %551 }
 0x331   : > { %v559_v24 = vsub.f32 %v547_v16, %v552_v23 }
 0x333   : > { %v563_v25 = vmul.f32 1.442695, %v559_v24 }
 0x334   : > { %v556_v26 = vpop.xlane.xlu1 %555  ;;  %v554_v27 = vpop.xlane.xlu0 %553 }
 0x335   : > { %1145 = vpow2.f32 %v563_v25  ;;  %v561_v28 = vsub.f32 %v549_v19, %v556_v26  ;;  %v560_v29 = vsub.f32 %v548_v20, %v554_v27 }
 0x337   : > { %v567_v30 = vmul.f32 1.442695, %v561_v28  ;;  %v565_v31 = vmul.f32 1.442695, %v560_v29 }
 0x338   : > { %v558_v32 = vpop.xlane.xlu1 %557 }
 0x339   : > { %1147 = vpow2.f32 %v567_v30  ;;  %v562_v33 = vsub.f32 %v550_v22, %v558_v32 }
 0x33a   : > { %1149 = vpow2.f32 %v565_v31 }
 0x33b   : > { %v569_v34 = vmul.f32 1.442695, %v562_v33 }
 0x33d   : > { %1151 = vpow2.f32 %v569_v34 }
 0x342   : > { %v1146_v35 = vpop.eup %1145 }
 0x343   : > { %v571_v36 = vsel %vm538_vm1, %v1146_v35, 0.0 }
 0x344   : > { %575 = vadd.xlane.f32.xlu0 %v571_v36 }
 0x346   : > { %v1148_v37 = vpop.eup %1147 }
 0x347   : > { %v1150_v38 = vpop.eup %1149  ;;  %v573_v39 = vsel %vm538_vm1, %v1148_v37, 0.0 }
 0x348   : > { %579 = vadd.xlane.f32.xlu0 %v573_v39  ;;  %v572_v40 = vsel %vm538_vm1, %v1150_v38, 0.0 }
 0x349   : > { %577 = vadd.xlane.f32.xlu1 %v572_v40 }
 0x34a   : > { %v1152_v41 = vpop.eup %1151 }
 0x34b   : > { %v574_v42 = vsel %vm538_vm1, %v1152_v41, 0.0 }
 0x34d   : > { %581 = vadd.xlane.f32.xlu1 %v574_v42 }
 0x3cd   : > { %v576_v43 = vpop.xlane.xlu0 %575 }
 0x3ce   : > { %1153 = vrcp.f32 %v576_v43 }
 0x3d1   : > { %v580_v44 = vpop.xlane.xlu0 %579 }
 0x3d2   : > { %v578_v45 = vpop.xlane.xlu1 %577  ;;  %1155 = vrcp.f32 %v580_v44 }
 0x3d3   : > { %1157 = vrcp.f32 %v578_v45 }
 0x3d6   : > { %v582_v46 = vpop.xlane.xlu1 %581 }
 0x3d7   : > { %1159 = vrcp.f32 %v582_v46 }
 0x3db   : > { %v1154_v47 = vpop.eup %1153 }
 0x3dc   : > { %v587_v48 = vmul.f32 %v1154_v47, %v576_v43 }
 0x3de   : > { %v591_v49 = vsub.f32 2.0, %v587_v48 }
 0x3df   : > { %v1156_v50 = vpop.eup %1155 }
 0x3e0   : > { %v1158_v51 = vpop.eup %1157  ;;  %v595_v52 = vmul.f32 %v1154_v47, %v591_v49  ;;  %v589_v53 = vmul.f32 %v1156_v50, %v580_v44 }
 0x3e1   : > { %v588_v54 = vmul.f32 %v1158_v51, %v578_v45 }
 0x3e2   : > { %v599_v55 = vmul.f32 %v595_v52, %v571_v36  ;;  %v593_v56 = vsub.f32 2.0, %v589_v53 }
 0x3e3   : > { %v592_v57 = vsub.f32 2.0, %v588_v54 }
 0x3e4   : > { %v1160_v58 = vpop.eup %1159  ;;  %v604_v59 = vsel %vm603_vm2, %v1372_v4, %v599_v55  ;;  %v597_v60 = vmul.f32 %v1156_v50, %v593_v56 }
 0x3e5   : > { %608 = vst [vmem:[%s1406_s12] sm:$0xff] %v604_v59  ;;  %v596_v61 = vmul.f32 %v1158_v51, %v592_v57  ;;  %v590_v62 = vmul.f32 %v1160_v58, %v582_v46 }
 0x3e6   : > { %v601_v63 = vmul.f32 %v597_v60, %v573_v39 }
 0x3e7   : > { %v600_v0 = vmul.f32 %v596_v61, %v572_v40  ;;  %v594_v1 = vsub.f32 2.0, %v590_v62 }
 0x3e8   : > { %v606_v3 = vsel %vm603_vm2, %v1378_v10, %v601_v63 }
 0x3e9   : > { %v605_v4 = vsel %vm603_vm2, %v1370_v2, %v600_v0  ;;  %610 = vst [vmem:[%s1406_s12 + $0x10] sm:$0xff] %v606_v3  ;;  %v598_v5 = vmul.f32 %v1160_v58, %v594_v1 }
 0x3ea   : > { %609 = vst [vmem:[%s1406_s12 + $0x8] sm:$0xff] %v605_v4  ;;  %618 = sbr.rel (!%p1327_p4) target bundleno = 1046 (0x416), region = 40 }
 0x3eb   : > { %v602_v6 = vmul.f32 %v598_v5, %v574_v42 }
 0x3ed   : > { %v607_v7 = vsel %vm603_vm2, %v1376_v8, %v602_v6 }
 0x3ee   : > { %611 = vst [vmem:[%s1406_s12 + $0x18] sm:$0xff] %v607_v7 }
 0x3ef   : > { %s1490_s22 = smov (!%p621_p6, %s620_s22), 4 }
 0x3f0   : > { %s870_s27 = sshll.u32 %s1490_s22, 7 }
 0x3f1   : > { %p873_p7 = scmp.eq.s32.totalorder %s870_s27, 0 }
 0x3f2   : > { %s1434_s28 = sshrl.u32 (!%p873_p7), %s1490_s22, 2 }
 0x3f3   : > { %629 = sbr.rel (%p873_p7) target bundleno = 1046 (0x416), region = 44  ;;  %p874_p4 = scmp.le.s32.totalorder (!%p873_p7), %s1434_s28, 0 }
 0x3f8   : > { %799 = sbr.rel (%p874_p4) target bundleno = 1029 (0x405), region = 121  ;;  %s1483_s15 = smov (!%p874_p4), %s1428_s26 }
 0x3f9   : > { %s1484_s20 = smov (!%p874_p4), %s1406_s12  ;;  %s1443_s29 = smov (!%p874_p4), 0  }
 0x3fa   : > { %s1259_s30 = smov (!%p874_p4), 0  }
 0x3fd LB: >> { %v698_v2 = vld [vmem:[%s1253_s20] sm:$0xff]  ;;  %v700_v8 = vld [vmem:[%s1253_s20 + $0x8] sm:$0xff]  ;;  %v702_v9 = vld [vmem:[%s1253_s20 + $0x10] sm:$0xff]  ;;  %s706_s4 = sadd.s32 1, %s1257_s29  ;;  %s692_s30 = sadd.s32 1, %s1261_s30   ;;  %s1261_s30 = sphi %s1259_s30, %s692_s30   ;;  %s1257_s29 = sphi %s1443_s29, %s1485_s29   ;;  %s1253_s20 = sphi %s1484_s20, %s711_s20   ;;  %s1249_s15 = sphi %s1483_s15, %s712_s15  }
 0x3fe   : >> { %699 = vst [vmem:[%s1249_s15] sm:$0xff] %v698_v2  ;;  %701 = vst [vmem:[%s1249_s15 + $0x8] sm:$0xff] %v700_v8  ;;  %v704_v10 = vld [vmem:[%s1253_s20 + $0x18] sm:$0xff]  ;;  %p707_p8 = scmp.ge.s32.totalorder %s706_s4, %s1434_s28  ;;  %p691_p9 = scmp.ge.s32.totalorder %s692_s30, %s1434_s28 }
 0x3ff   : >> { %703 = vst [vmem:[%s1249_s15 + $0x10] sm:$0xff] %v702_v9  ;;  %705 = vst [vmem:[%s1249_s15 + $0x18] sm:$0xff] %v704_v10 }
 0x400   : >> { %s1492_s4 = smov (%p707_p8, %s706_s4), 0  ;;  %694 = sbr.rel (!%p691_p9) target bundleno = 1021 (0x3fd), region = 127 }
 0x401   : >> { %s875_s5 = sshll.u32 %s1492_s4, 5  ;;  %s1485_s29 = smov %s1492_s4 }
 0x402   : >> { %s711_s20 = scalar_lea.vmem %s1406_s12, %s875_s5 [#allocation4]   ;;  %s712_s15 = scalar_lea.vmem %s1428_s26, %s875_s5  }
 0x405 PF: > { %s1459_s6 = sand.u32 3, %s1490_s22   ;;  %s886_s7 = sshll.u32 %s1434_s28, 5 }
 0x406   : > { %s717_s8 = scalar_lea.vmem %s1406_s12, %s886_s7 [#allocation4]   ;;  %s719_s9 = scalar_lea.vmem %s1428_s26, %s886_s7  }
 0x407   : > { %p880_p10 = scmp.le.s32.totalorder %s1459_s6, 0 }
 0x408   : > { %s1263_s10 = smov (!%p880_p10), %s719_s9   ;;  %s1267_s11 = smov (!%p880_p10), %s717_s8  }
 0x409   : > { %813 = sbr.rel (%p880_p10) target bundleno = 1046 (0x416), region = 132  ;;  %s1271_s14 = smov (!%p880_p10), 0  }
 0x40a   : > { %s1275_s17 = smov (!%p880_p10), 0  }
 0x40e LB: >> { %v729_v11 = vld [vmem:[%s1269_s11] sm:$0xff]  ;;  %s731_s18 = sadd.s32 1, %s1273_s14  ;;  %s723_s17 = sadd.s32 1, %s1277_s17   ;;  %s1277_s17 = sphi %s1275_s17, %s723_s17   ;;  %s1273_s14 = sphi %s1271_s14, %s1272_s14   ;;  %s1269_s11 = sphi %s1267_s11, %s736_s11   ;;  %s1265_s10 = sphi %s1263_s10, %s737_s10  }
 0x40f   : >> { %730 = vst [vmem:[%s1265_s10] sm:$0xff] %v729_v11  ;;  %p732_p11 = scmp.ge.s32.totalorder %s731_s18, %s1459_s6  ;;  %p722_p12 = scmp.ge.s32.totalorder %s723_s17, %s1459_s6 }
 0x411   : >> { %s1494_s18 = smov (%p732_p11, %s731_s18), 0  ;;  %725 = sbr.rel (!%p722_p12) target bundleno = 1038 (0x40e), region = 138 }
 0x412   : >> { %s881_s21 = sshll.u32 %s1494_s18, 3  ;;  %s1272_s14 = smov %s1494_s18  }
 0x413   : >> { %s736_s11 = scalar_lea.vmem %s717_s8, %s881_s21 [#allocation4]   ;;  %s737_s10 = scalar_lea.vmem %s719_s9, %s881_s21  }
 0x416 PF: > { %p11_p13 = scmp.ge.s32.totalorder %s1317_s16, 4   ;;  %s1486_s12 = smov %s1241_s13 }
 0x417   : > { %s1487_s13 = smov %s1325_s19  ;;  %s1488_s14 = smov %s1317_s16 }
 0x418   :  { %13 = sbr.rel (!%p11_p13) target bundleno = 2 (0x2), region = 149 }
 0x41d   :  { %753 = vsyncpa [#allocation3], 1 }
 0x41e   :  { %755 = vsyncpa [#allocation3 + $0x1], 1 }

</bundles_post_ra>
